<compile_context>
chip_gen: v5e
topology: v5e:2x2
jax: 0.10.0
libtpu: 0.0.40
codegen_flags: <defaults>
</compile_context>

<pallas_src>
import functools

import jax
import jax.numpy as jnp
from jax.experimental import pallas as pl
from jax.experimental.pallas import tpu as pltpu


def _sigmoid(x):
    # logistic via tanh: one EUP push per element (vs exp + reciprocal).
    return 0.5 * jnp.tanh(0.5 * x) + 0.5


# ----------------------------------------------------------------------------
# Fused bidirectional recurrent kernel.
# grid = (nT,) iterates sequentially; h/c for BOTH directions live in a
# (2, B, H) VMEM scratch carried across grid steps (and in SSA values inside
# a grid step). Each grid step consumes tb timesteps of pre-computed input
# gates for the forward direction (time block t) and tb timesteps for the
# reverse direction (time block nT-1-t, traversed back-to-front), and writes
# both directions' hidden outputs. W_hh for both directions is staged once
# into single-buffered VMEM scratch at t == 0.
# ----------------------------------------------------------------------------
def _bidir_lstm_kernel(gf_ref, gr_ref, whh_f_hbm, whh_r_hbm, h0_ref, c0_ref,
                       out_f_ref, out_r_ref, hN_ref, cN_ref,
                       h_sc, c_sc, whh_f_sc, whh_r_sc, dma_sem,
                       *, hidden, tb, seq_len, num_blocks, ragged):
    t = pl.program_id(0)
    H = hidden

    @pl.when(t == 0)
    def _init():
        # One-time: stage both recurrent weights into single-buffered VMEM
        # scratch (they are grid-constant, so the pipeline's double buffer
        # would be pure VMEM waste), and load the initial states.
        cp_f = pltpu.make_async_copy(whh_f_hbm, whh_f_sc, dma_sem.at[0])
        cp_r = pltpu.make_async_copy(whh_r_hbm, whh_r_sc, dma_sem.at[1])
        cp_f.start()
        cp_r.start()
        h_sc[...] = h0_ref[...].astype(jnp.float32)
        c_sc[...] = c0_ref[...].astype(jnp.float32)
        cp_f.wait()
        cp_r.wait()

    whh_f = whh_f_sc[...]              # (H, 4H), compute dtype (bf16 or f32)
    whh_r = whh_r_sc[...]
    mm_dtype = whh_f.dtype

    # SSA carries: one scratch load per grid step, one store at the end; the
    # per-timestep recurrence never round-trips through VMEM.
    h_f = h_sc[0]
    c_f = c_sc[0]
    h_r = h_sc[1]
    c_r = c_sc[1]

    def lstm_update(gates, c):         # gates: (B, 4H) f32, c: (B, H) f32
        i_g = _sigmoid(gates[:, 0 * H:1 * H])
        f_g = _sigmoid(gates[:, 1 * H:2 * H])
        g_g = jnp.tanh(gates[:, 2 * H:3 * H])
        o_g = _sigmoid(gates[:, 3 * H:4 * H])
        cy = f_g * c + i_g * g_g
        hy = o_g * jnp.tanh(cy)
        return hy, cy

    # tb is a small compile-time constant: fully unrolled so the two
    # directions' independent chains interleave on the MXU/EUP.
    # Note: no precision pin on the in-kernel dot; for f32 operands Mosaic's
    # default MXU path is used (validated to ~1e-3 vs a HIGHEST-precision
    # reference below).
    for j in range(tb):
        # forward direction: original timestep t*tb + j
        gates_f = gf_ref[j].astype(jnp.float32) + jnp.dot(
            h_f.astype(mm_dtype), whh_f, preferred_element_type=jnp.float32)
        # reverse direction: original timestep (nT-1-t)*tb + (tb-1-j)
        gates_r = gr_ref[tb - 1 - j].astype(jnp.float32) + jnp.dot(
            h_r.astype(mm_dtype), whh_r, preferred_element_type=jnp.float32)

        hy_f, cy_f = lstm_update(gates_f, c_f)
        hy_r, cy_r = lstm_update(gates_r, c_r)

        if ragged:  # compile-time flag: only emitted when S % tb != 0
            valid_f = (t * tb + j) < seq_len
            valid_r = ((num_blocks - 1 - t) * tb + (tb - 1 - j)) < seq_len
            hy_f = jnp.where(valid_f, hy_f, h_f)
            cy_f = jnp.where(valid_f, cy_f, c_f)
            hy_r = jnp.where(valid_r, hy_r, h_r)
            cy_r = jnp.where(valid_r, cy_r, c_r)

        h_f, c_f = hy_f, cy_f
        h_r, c_r = hy_r, cy_r
        out_f_ref[j] = hy_f.astype(out_f_ref.dtype)
        out_r_ref[tb - 1 - j] = hy_r.astype(out_r_ref.dtype)

    h_sc[0] = h_f
    c_sc[0] = c_f
    h_sc[1] = h_r
    c_sc[1] = c_r

    @pl.when(t == pl.num_programs(0) - 1)
    def _fin():
        hN_ref[...] = h_sc[...].astype(hN_ref.dtype)
        cN_ref[...] = c_sc[...].astype(cN_ref.dtype)


def _input_projection(x, w_ih, b_ih, b_hh, compute_dtype):
    """Hoisted projection: (S,B,I) -> (S,B,4H) pre-gates, one big matmul."""
    S, B, I = x.shape
    H4 = w_ih.shape[0]
    prec = jax.lax.Precision.HIGHEST if compute_dtype == jnp.float32 else None
    pre = jnp.dot(x.reshape(S * B, I).astype(compute_dtype),
                  w_ih.T.astype(compute_dtype),
                  preferred_element_type=jnp.float32,
                  precision=prec)
    # Biases added in f32 before the (optional) bf16 cast of the pre-gates.
    pre = pre + (b_ih + b_hh).astype(jnp.float32)[None, :]
    return pre.reshape(S, B, H4).astype(compute_dtype)


# Conservative VMEM budget (leaves headroom on v7x where physical VMEM is
# 64 MiB per TensorCore; v5e/v6e have 128 MiB).
_VMEM_BUDGET_BYTES = 44 * 1024 * 1024


@functools.partial(jax.jit,
                   static_argnames=("time_block", "compute_dtype", "concat_output"))
def bidir_lstm_layer_pallas(x, fwd, rev, h0f, c0f, h0r, c0r, *,
                            time_block=8, compute_dtype=jnp.bfloat16,
                            concat_output=True):
    """Fused bidirectional LSTM layer.

    x: (S, B, I); fwd/rev: dicts with w_ih (4H,I), w_hh (4H,H), b_ih, b_hh.
    h0*/c0*: (B, H) initial states per direction.
    Returns: out (S,B,2H) (or the (fwd, rev) halves if concat_output=False),
             (h_fwd, c_fwd), (h_rev, c_rev).
    """
    S, B, I = x.shape
    H = fwd["w_hh"].shape[1]

    # ---- time block: as large as the VMEM budget allows (amortizes the
    # per-grid-step overhead and issues fewer, larger pre-gate DMAs). ----
    tb = max(1, min(time_block, S))
    item = jnp.dtype(compute_dtype).itemsize
    oitem = jnp.dtype(x.dtype).itemsize

    def vmem_estimate(tb_):
        pre = 2 * 2 * tb_ * B * 4 * H * item   # double-buffered pre-gate streams, 2 dirs
        out = 2 * 2 * tb_ * B * H * oitem      # double-buffered output blocks, 2 dirs
        wts = 2 * H * 4 * H * item             # single-buffered W_hh scratch, 2 dirs
        carry = 2 * 2 * B * H * 4              # h/c f32 carry scratch
        states = 8 * 2 * B * H * 4             # h0/c0 inputs + hN/cN outputs
        return pre + out + wts + carry + states

    while tb > 1 and vmem_estimate(tb) > _VMEM_BUDGET_BYTES:
        tb -= 1

    nT = pl.cdiv(S, tb)
    S_pad = nT * tb
    ragged = S_pad != S

    # Hoisted input projections (one well-shaped matmul per direction).
    pre_f = _input_projection(x, fwd["w_ih"], fwd["b_ih"], fwd["b_hh"], compute_dtype)
    pre_r = _input_projection(x, rev["w_ih"], rev["b_ih"], rev["b_hh"], compute_dtype)
    if ragged:
        # cdiv grid + zero-padded tail (padded steps have their state update
        # masked in-kernel) instead of collapsing to tb=1 for awkward S.
        pad = ((0, S_pad - S), (0, 0), (0, 0))
        pre_f = jnp.pad(pre_f, pad)
        pre_r = jnp.pad(pre_r, pad)

    whh_f = fwd["w_hh"].T.astype(compute_dtype)      # (H, 4H), stays in HBM
    whh_r = rev["w_hh"].T.astype(compute_dtype)
    h0 = jnp.stack([h0f, h0r]).astype(jnp.float32)   # (2, B, H)
    c0 = jnp.stack([c0f, c0r]).astype(jnp.float32)   # (2, B, H)

    kernel = functools.partial(_bidir_lstm_kernel, hidden=H, tb=tb,
                               seq_len=S, num_blocks=nT, ragged=ragged)

    out_f, out_r, hN, cN = pl.pallas_call(
        kernel,
        out_shape=(
            jax.ShapeDtypeStruct((S_pad, B, H), x.dtype),
            jax.ShapeDtypeStruct((S_pad, B, H), x.dtype),
            jax.ShapeDtypeStruct((2, B, H), jnp.float32),
            jax.ShapeDtypeStruct((2, B, H), jnp.float32),
        ),
        grid_spec=pltpu.PrefetchScalarGridSpec(
            num_scalar_prefetch=0,
            grid=(nT,),
            in_specs=[
                pl.BlockSpec((tb, B, 4 * H), lambda t: (t, 0, 0)),           # pre_f
                pl.BlockSpec((tb, B, 4 * H), lambda t: (nT - 1 - t, 0, 0)),  # pre_r
                pl.BlockSpec(memory_space=pl.ANY),                           # whh_f (HBM)
                pl.BlockSpec(memory_space=pl.ANY),                           # whh_r (HBM)
                pl.BlockSpec((2, B, H), lambda t: (0, 0, 0)),                # h0
                pl.BlockSpec((2, B, H), lambda t: (0, 0, 0)),                # c0
            ],
            out_specs=[
                pl.BlockSpec((tb, B, H), lambda t: (t, 0, 0)),               # out_f
                pl.BlockSpec((tb, B, H), lambda t: (nT - 1 - t, 0, 0)),      # out_r
                pl.BlockSpec((2, B, H), lambda t: (0, 0, 0)),                # hN
                pl.BlockSpec((2, B, H), lambda t: (0, 0, 0)),                # cN
            ],
            scratch_shapes=[
                pltpu.VMEM((2, B, H), jnp.float32),      # h carry (fwd, rev)
                pltpu.VMEM((2, B, H), jnp.float32),      # c carry (fwd, rev)
                pltpu.VMEM((H, 4 * H), compute_dtype),   # W_hh fwd (single-buffered)
                pltpu.VMEM((H, 4 * H), compute_dtype),   # W_hh rev (single-buffered)
                pltpu.SemaphoreType.DMA((2,)),           # weight-staging DMA sems
            ],
        ),
        # h0/c0 buffers are reused for the final states hN/cN.
        input_output_aliases={4: 2, 5: 3},
        compiler_params=pltpu.CompilerParams(
            dimension_semantics=("arbitrary",),          # recurrence -> sequential
            vmem_limit_bytes=48 * 1024 * 1024,           # < v7x's 64 MiB physical
        ),
    )(pre_f, pre_r, whh_f, whh_r, h0, c0)

    if ragged:
        out_f = out_f[:S]
        out_r = out_r[:S]

    if concat_output:
        # Matches torch's torch.cat(outputs, -1). Consumers that can take the
        # split halves (split next-layer weights) should use
        # concat_output=False to skip this extra HBM read+write pass.
        out = jnp.concatenate([out_f, out_r], axis=-1)
    else:
        out = (out_f, out_r)
    return out, (hN[0], cN[0]), (hN[1], cN[1])


# ----------------------------------------------------------------------------
# Parameters / module wrapper (matches torch LSTMCell init: randn weights,
# forget-gate bias split 0 / 1).
# ----------------------------------------------------------------------------
def init_cell_params(key, input_size, hidden_size):
    k1, k2, k3, k4 = jax.random.split(key, 4)
    w_ih = jax.random.normal(k1, (4 * hidden_size, input_size), jnp.float32)
    w_hh = jax.random.normal(k2, (4 * hidden_size, hidden_size), jnp.float32)
    b_ih = jax.random.normal(k3, (4 * hidden_size,), jnp.float32)
    b_hh = jax.random.normal(k4, (4 * hidden_size,), jnp.float32)
    b_ih = b_ih.at[hidden_size:2 * hidden_size].set(0.0)
    b_hh = b_hh.at[hidden_size:2 * hidden_size].set(1.0)
    return dict(w_ih=w_ih, w_hh=w_hh, b_ih=b_ih, b_hh=b_hh)


class BidirLSTMLayerPallas:
    def __init__(self, key, input_size, hidden_size):
        kf, kr = jax.random.split(key)
        self.hidden_size = hidden_size
        self.fwd = init_cell_params(kf, input_size, hidden_size)
        self.rev = init_cell_params(kr, input_size, hidden_size)

    def __call__(self, x, states, *, time_block=8, compute_dtype=jnp.bfloat16):
        # states[0]: ((1,B,H),(1,B,H)) for the forward LSTMLayer
        # states[1]: ((B,H),(B,H))     for the ReverseLSTMLayer (no squeeze in torch code)
        (h0f, c0f), (h0r, c0r) = states
        h0f, c0f = h0f[0], c0f[0]
        out, (hf, cf), (hr, cr) = bidir_lstm_layer_pallas(
            x, self.fwd, self.rev, h0f, c0f, h0r, c0r,
            time_block=time_block, compute_dtype=compute_dtype)
        # Mirror the torch return structure: fwd state re-unsqueezed, rev not.
        output_states = [(hf[None], cf[None]), (hr, cr)]
        return out, output_states


# ----------------------------------------------------------------------------
# Pure-JAX reference (mirrors the PyTorch forward exactly) for validation.
# ----------------------------------------------------------------------------
def _cell_ref(x, h, c, p):
    hp = jax.lax.Precision.HIGHEST
    gates = (jnp.dot(x, p["w_ih"].T, precision=hp) + p["b_ih"]
             + jnp.dot(h, p["w_hh"].T, precision=hp) + p["b_hh"])
    i, f, g, o = jnp.split(gates, 4, axis=1)
    i, f, g, o = jax.nn.sigmoid(i), jax.nn.sigmoid(f), jnp.tanh(g), jax.nn.sigmoid(o)
    c = f * c + i * g
    h = o * jnp.tanh(c)
    return h, c


def _layer_ref(x, h, c, p, reverse=False):
    S = x.shape[0]
    order = range(S - 1, -1, -1) if reverse else range(S)
    outs = [None] * S
    for t in order:
        h, c = _cell_ref(x[t], h, c, p)
        outs[t] = h
    return jnp.stack(outs), (h, c)


def bidir_ref(x, states, layer):
    (h0f, c0f), (h0r, c0r) = states
    of, (hf, cf) = _layer_ref(x, h0f[0], c0f[0], layer.fwd, reverse=False)
    orv, (hr, cr) = _layer_ref(x, h0r, c0r, layer.rev, reverse=True)
    return jnp.concatenate([of, orv], axis=-1), (hf, cf), (hr, cr)


if __name__ == "__main__":
    SEQ, BATCH, INPUT, HIDDEN = 8, 4, 16, 32
    # TODO(synk): production shapes should use B % 8 == 0 (ideally >= 128) and
    #             H % 128 == 0 for lane-dense stores / full MXU utilization.

    key = jax.random.PRNGKey(0)
    k_param, k_x, k_s = jax.random.split(key, 3)

    layer = BidirLSTMLayerPallas(k_param, INPUT, HIDDEN)

    x = jax.random.normal(k_x, (SEQ, BATCH, INPUT), jnp.float32)
    ks = jax.random.split(k_s, 4)
    states = [
        (jax.random.normal(ks[0], (1, BATCH, HIDDEN), jnp.float32),
         jax.random.normal(ks[1], (1, BATCH, HIDDEN), jnp.float32)),
        (jax.random.normal(ks[2], (BATCH, HIDDEN), jnp.float32),
         jax.random.normal(ks[3], (BATCH, HIDDEN), jnp.float32)),
    ]

    ref_out, (hf_ref, cf_ref), (hr_ref, cr_ref) = bidir_ref(x, states, layer)

    # 1) Strict correctness: f32 compute, multi-block grid (time_block=2 -> 4 steps).
    out32, st32 = layer(x, states, time_block=2, compute_dtype=jnp.float32)
    out32 = jax.block_until_ready(out32)
    assert out32.shape == (SEQ, BATCH, 2 * HIDDEN), out32.shape
    assert jnp.allclose(out32, ref_out, rtol=1e-3, atol=1e-3), float(
        jnp.max(jnp.abs(out32 - ref_out)))
    assert jnp.allclose(st32[0][0][0], hf_ref, rtol=1e-3, atol=1e-3)
    assert jnp.allclose(st32[0][1][0], cf_ref, rtol=1e-3, atol=1e-3)
    assert jnp.allclose(st32[1][0], hr_ref, rtol=1e-3, atol=1e-3)
    assert jnp.allclose(st32[1][1], cr_ref, rtol=1e-3, atol=1e-3)

    # 2) Default fast path: bf16 MXU operands, f32 accumulation/carries.
    out_bf, _ = layer(x, states, compute_dtype=jnp.bfloat16)
    out_bf = jax.block_until_ready(out_bf)
    assert out_bf.shape == (SEQ, BATCH, 2 * HIDDEN), out_bf.shape
    assert float(jnp.max(jnp.abs(out_bf - ref_out))) < 0.15

    # 3) Ragged sequence length (S=7, time_block=4): exercises the cdiv grid,
    #    zero-padded tail and in-kernel masked state carry.
    S2 = 7
    x2 = x[:S2]
    ref2, (hf2, cf2), (hr2, cr2) = bidir_ref(x2, states, layer)
    out2, st2 = layer(x2, states, time_block=4, compute_dtype=jnp.float32)
    out2 = jax.block_until_ready(out2)
    assert out2.shape == (S2, BATCH, 2 * HIDDEN), out2.shape
    assert jnp.allclose(out2, ref2, rtol=1e-3, atol=1e-3), float(
        jnp.max(jnp.abs(out2 - ref2)))
    assert jnp.allclose(st2[0][0][0], hf2, rtol=1e-3, atol=1e-3)
    assert jnp.allclose(st2[0][1][0], cf2, rtol=1e-3, atol=1e-3)
    assert jnp.allclose(st2[1][0], hr2, rtol=1e-3, atol=1e-3)
    assert jnp.allclose(st2[1][1], cr2, rtol=1e-3, atol=1e-3)

    print("KERNEL_OK")
</pallas_src>

<mosaic_0001>
module attributes {stable_mosaic.version = 11 : i64} {
  func.func @_bidir_lstm_kernel(%arg0: i32, %arg1: memref<2x4x128xf32, #tpu.memory_space<vmem>>, %arg2: memref<2x4x128xf32, #tpu.memory_space<vmem>>, %arg3: memref<32x128xf32, #tpu.memory_space<any>>, %arg4: memref<32x128xf32, #tpu.memory_space<any>>, %arg5: memref<2x4x32xf32, #tpu.memory_space<vmem>>, %arg6: memref<2x4x32xf32, #tpu.memory_space<vmem>>, %arg7: memref<2x4x32xf32, #tpu.memory_space<vmem>>, %arg8: memref<2x4x32xf32, #tpu.memory_space<vmem>>, %arg9: memref<2x4x32xf32, #tpu.memory_space<vmem>>, %arg10: memref<2x4x32xf32, #tpu.memory_space<vmem>>, %arg11: memref<2x4x32xf32, #tpu.memory_space<vmem>>, %arg12: memref<2x4x32xf32, #tpu.memory_space<vmem>>, %arg13: memref<32x128xf32, #tpu.memory_space<vmem>>, %arg14: memref<32x128xf32, #tpu.memory_space<vmem>>, %arg15: memref<2x!tpu.dma_semaphore, #tpu.memory_space<semaphore_mem>>) attributes {dimension_semantics = [#tpu.dimension_semantics<arbitrary>], iteration_bounds = array<i64: 4>, scalar_prefetch = 0 : i64, scratch_operands = 5 : i64, tpu.core_type = #tpu.core_type<tc>, window_params = [{transform_indices = @transform_0, window_bounds = array<i64: 2, 4, 128>}, {transform_indices = @transform_1, window_bounds = array<i64: 2, 4, 128>}, {}, {}, {pipeline_mode = #tpu.pipeline_mode<synchronous>, transform_indices = @transform_4, window_bounds = array<i64: 2, 4, 32>}, {pipeline_mode = #tpu.pipeline_mode<synchronous>, transform_indices = @transform_5, window_bounds = array<i64: 2, 4, 32>}, {transform_indices = @transform_6, window_bounds = array<i64: 2, 4, 32>}, {transform_indices = @transform_7, window_bounds = array<i64: 2, 4, 32>}, {pipeline_mode = #tpu.pipeline_mode<synchronous>, transform_indices = @transform_8, window_bounds = array<i64: 2, 4, 32>}, {pipeline_mode = #tpu.pipeline_mode<synchronous>, transform_indices = @transform_9, window_bounds = array<i64: 2, 4, 32>}]} {
    %c0_i32 = arith.constant 0 : i32
    %0 = arith.cmpi eq, %arg0, %c0_i32 : i32
    %1 = arith.extui %0 : i1 to i32
    %c0_i32_0 = arith.constant 0 : i32
    %2 = arith.cmpi ne, %1, %c0_i32_0 : i32
    scf.if %2 {
      %c0_i32_91 = arith.constant 0 : i32
      %180 = tpu.memref_slice %arg15[%c0_i32_91] : memref<2x!tpu.dma_semaphore, #tpu.memory_space<semaphore_mem>> -> memref<1x!tpu.dma_semaphore, #tpu.memory_space<semaphore_mem>>
      %181 = tpu.memref_squeeze %180 : memref<1x!tpu.dma_semaphore, #tpu.memory_space<semaphore_mem>> -> memref<!tpu.dma_semaphore, #tpu.memory_space<semaphore_mem>>
      tpu.enqueue_dma source(%arg3 : memref<32x128xf32, #tpu.memory_space<any>>) target(%arg13 : memref<32x128xf32, #tpu.memory_space<vmem>>) target_semaphore(%181 : memref<!tpu.dma_semaphore, #tpu.memory_space<semaphore_mem>>)
      %c1_i32 = arith.constant 1 : i32
      %182 = tpu.memref_slice %arg15[%c1_i32] : memref<2x!tpu.dma_semaphore, #tpu.memory_space<semaphore_mem>> -> memref<1x!tpu.dma_semaphore, #tpu.memory_space<semaphore_mem>>
      %183 = tpu.memref_squeeze %182 : memref<1x!tpu.dma_semaphore, #tpu.memory_space<semaphore_mem>> -> memref<!tpu.dma_semaphore, #tpu.memory_space<semaphore_mem>>
      tpu.enqueue_dma source(%arg4 : memref<32x128xf32, #tpu.memory_space<any>>) target(%arg14 : memref<32x128xf32, #tpu.memory_space<vmem>>) target_semaphore(%183 : memref<!tpu.dma_semaphore, #tpu.memory_space<semaphore_mem>>)
      %c0_92 = arith.constant 0 : index
      %c0_93 = arith.constant 0 : index
      %c0_94 = arith.constant 0 : index
      %184 = vector.load %arg5[%c0_92, %c0_93, %c0_94] : memref<2x4x32xf32, #tpu.memory_space<vmem>>, vector<2x4x32xf32>
      %c0_95 = arith.constant 0 : index
      %c0_96 = arith.constant 0 : index
      %c0_97 = arith.constant 0 : index
      %185 = vector.load %arg11[%c0_95, %c0_96, %c0_97] : memref<2x4x32xf32, #tpu.memory_space<vmem>>, vector<2x4x32xf32>
      tpu.vector_store %arg11[%c0_95, %c0_96, %c0_97], %184 {strides = array<i32>} : memref<2x4x32xf32, #tpu.memory_space<vmem>>, vector<2x4x32xf32>,
      %c0_98 = arith.constant 0 : index
      %c0_99 = arith.constant 0 : index
      %c0_100 = arith.constant 0 : index
      %186 = vector.load %arg6[%c0_98, %c0_99, %c0_100] : memref<2x4x32xf32, #tpu.memory_space<vmem>>, vector<2x4x32xf32>
      %c0_101 = arith.constant 0 : index
      %c0_102 = arith.constant 0 : index
      %c0_103 = arith.constant 0 : index
      %187 = vector.load %arg12[%c0_101, %c0_102, %c0_103] : memref<2x4x32xf32, #tpu.memory_space<vmem>>, vector<2x4x32xf32>
      tpu.vector_store %arg12[%c0_101, %c0_102, %c0_103], %186 {strides = array<i32>} : memref<2x4x32xf32, #tpu.memory_space<vmem>>, vector<2x4x32xf32>,
      %c0_i32_104 = arith.constant 0 : i32
      %188 = tpu.memref_slice %arg15[%c0_i32_104] : memref<2x!tpu.dma_semaphore, #tpu.memory_space<semaphore_mem>> -> memref<1x!tpu.dma_semaphore, #tpu.memory_space<semaphore_mem>>
      %189 = tpu.memref_squeeze %188 : memref<1x!tpu.dma_semaphore, #tpu.memory_space<semaphore_mem>> -> memref<!tpu.dma_semaphore, #tpu.memory_space<semaphore_mem>>
      tpu.wait_dma2 semaphore(%189 : memref<!tpu.dma_semaphore, #tpu.memory_space<semaphore_mem>>) src(%arg3 : memref<32x128xf32, #tpu.memory_space<any>>) dst(%arg13 : memref<32x128xf32, #tpu.memory_space<vmem>>)
      %c1_i32_105 = arith.constant 1 : i32
      %190 = tpu.memref_slice %arg15[%c1_i32_105] : memref<2x!tpu.dma_semaphore, #tpu.memory_space<semaphore_mem>> -> memref<1x!tpu.dma_semaphore, #tpu.memory_space<semaphore_mem>>
      %191 = tpu.memref_squeeze %190 : memref<1x!tpu.dma_semaphore, #tpu.memory_space<semaphore_mem>> -> memref<!tpu.dma_semaphore, #tpu.memory_space<semaphore_mem>>
      tpu.wait_dma2 semaphore(%191 : memref<!tpu.dma_semaphore, #tpu.memory_space<semaphore_mem>>) src(%arg4 : memref<32x128xf32, #tpu.memory_space<any>>) dst(%arg14 : memref<32x128xf32, #tpu.memory_space<vmem>>)
    } else {
    }
    %c0 = arith.constant 0 : index
    %c0_1 = arith.constant 0 : index
    %3 = vector.load %arg13[%c0, %c0_1] : memref<32x128xf32, #tpu.memory_space<vmem>>, vector<32x128xf32>
    %c0_2 = arith.constant 0 : index
    %c0_3 = arith.constant 0 : index
    %4 = vector.load %arg14[%c0_2, %c0_3] : memref<32x128xf32, #tpu.memory_space<vmem>>, vector<32x128xf32>
    %c0_4 = arith.constant 0 : index
    %c0_5 = arith.constant 0 : index
    %c0_6 = arith.constant 0 : index
    %5 = vector.load %arg11[%c0_4, %c0_5, %c0_6] : memref<2x4x32xf32, #tpu.memory_space<vmem>>, vector<1x4x32xf32>
    %6 = vector.shape_cast %5 : vector<1x4x32xf32> to vector<4x32xf32>
    %c0_7 = arith.constant 0 : index
    %c0_8 = arith.constant 0 : index
    %c0_9 = arith.constant 0 : index
    %7 = vector.load %arg12[%c0_7, %c0_8, %c0_9] : memref<2x4x32xf32, #tpu.memory_space<vmem>>, vector<1x4x32xf32>
    %8 = vector.shape_cast %7 : vector<1x4x32xf32> to vector<4x32xf32>
    %c1 = arith.constant 1 : index
    %c0_10 = arith.constant 0 : index
    %c0_11 = arith.constant 0 : index
    %9 = vector.load %arg11[%c1, %c0_10, %c0_11] : memref<2x4x32xf32, #tpu.memory_space<vmem>>, vector<1x4x32xf32>
    %10 = vector.shape_cast %9 : vector<1x4x32xf32> to vector<4x32xf32>
    %c1_12 = arith.constant 1 : index
    %c0_13 = arith.constant 0 : index
    %c0_14 = arith.constant 0 : index
    %11 = vector.load %arg12[%c1_12, %c0_13, %c0_14] : memref<2x4x32xf32, #tpu.memory_space<vmem>>, vector<1x4x32xf32>
    %12 = vector.shape_cast %11 : vector<1x4x32xf32> to vector<4x32xf32>
    %c0_15 = arith.constant 0 : index
    %c0_16 = arith.constant 0 : index
    %c0_17 = arith.constant 0 : index
    %13 = vector.load %arg1[%c0_15, %c0_16, %c0_17] : memref<2x4x128xf32, #tpu.memory_space<vmem>>, vector<1x4x128xf32>
    %14 = vector.shape_cast %13 : vector<1x4x128xf32> to vector<4x128xf32>
    %cst = arith.constant dense<0.000000e+00> : vector<4x128xf32>
    %15 = tpu.matmul %6, %3, %cst {dimension_numbers = #tpu.dot_dimension_numbers<[1], [0], [0], [1], [0, 0, 1, 1], [], []>} : vector<4x32xf32>, vector<32x128xf32>, vector<4x128xf32> -> vector<4x128xf32>
    %16 = arith.addf %14, %15 : vector<4x128xf32>
    %c1_18 = arith.constant 1 : index
    %c0_19 = arith.constant 0 : index
    %c0_20 = arith.constant 0 : index
    %17 = vector.load %arg2[%c1_18, %c0_19, %c0_20] : memref<2x4x128xf32, #tpu.memory_space<vmem>>, vector<1x4x128xf32>
    %18 = vector.shape_cast %17 : vector<1x4x128xf32> to vector<4x128xf32>
    %cst_21 = arith.constant dense<0.000000e+00> : vector<4x128xf32>
    %19 = tpu.matmul %10, %4, %cst_21 {dimension_numbers = #tpu.dot_dimension_numbers<[1], [0], [0], [1], [0, 0, 1, 1], [], []>} : vector<4x32xf32>, vector<32x128xf32>, vector<4x128xf32> -> vector<4x128xf32>
    %20 = arith.addf %18, %19 : vector<4x128xf32>
    %21 = vector.extract_strided_slice %16 {offsets = [0, 0], sizes = [4, 32], strides = [1, 1]} : vector<4x128xf32> to vector<4x32xf32>
    %cst_22 = arith.constant 5.000000e-01 : f32
    %22 = vector.broadcast %cst_22 : f32 to vector<4x32xf32>
    %23 = arith.mulf %22, %21 : vector<4x32xf32>
    %24 = math.tanh %23 : vector<4x32xf32>
    %cst_23 = arith.constant 5.000000e-01 : f32
    %25 = vector.broadcast %cst_23 : f32 to vector<4x32xf32>
    %26 = arith.mulf %25, %24 : vector<4x32xf32>
    %cst_24 = arith.constant 5.000000e-01 : f32
    %27 = vector.broadcast %cst_24 : f32 to vector<4x32xf32>
    %28 = arith.addf %26, %27 : vector<4x32xf32>
    %29 = vector.extract_strided_slice %16 {offsets = [0, 32], sizes = [4, 32], strides = [1, 1]} : vector<4x128xf32> to vector<4x32xf32>
    %cst_25 = arith.constant 5.000000e-01 : f32
    %30 = vector.broadcast %cst_25 : f32 to vector<4x32xf32>
    %31 = arith.mulf %30, %29 : vector<4x32xf32>
    %32 = math.tanh %31 : vector<4x32xf32>
    %cst_26 = arith.constant 5.000000e-01 : f32
    %33 = vector.broadcast %cst_26 : f32 to vector<4x32xf32>
    %34 = arith.mulf %33, %32 : vector<4x32xf32>
    %cst_27 = arith.constant 5.000000e-01 : f32
    %35 = vector.broadcast %cst_27 : f32 to vector<4x32xf32>
    %36 = arith.addf %34, %35 : vector<4x32xf32>
    %37 = vector.extract_strided_slice %16 {offsets = [0, 64], sizes = [4, 32], strides = [1, 1]} : vector<4x128xf32> to vector<4x32xf32>
    %38 = math.tanh %37 : vector<4x32xf32>
    %39 = vector.extract_strided_slice %16 {offsets = [0, 96], sizes = [4, 32], strides = [1, 1]} : vector<4x128xf32> to vector<4x32xf32>
    %cst_28 = arith.constant 5.000000e-01 : f32
    %40 = vector.broadcast %cst_28 : f32 to vector<4x32xf32>
    %41 = arith.mulf %40, %39 : vector<4x32xf32>
    %42 = math.tanh %41 : vector<4x32xf32>
    %cst_29 = arith.constant 5.000000e-01 : f32
    %43 = vector.broadcast %cst_29 : f32 to vector<4x32xf32>
    %44 = arith.mulf %43, %42 : vector<4x32xf32>
    %cst_30 = arith.constant 5.000000e-01 : f32
    %45 = vector.broadcast %cst_30 : f32 to vector<4x32xf32>
    %46 = arith.addf %44, %45 : vector<4x32xf32>
    %47 = arith.mulf %36, %8 : vector<4x32xf32>
    %48 = arith.mulf %28, %38 : vector<4x32xf32>
    %49 = arith.addf %47, %48 : vector<4x32xf32>
    %50 = math.tanh %49 : vector<4x32xf32>
    %51 = arith.mulf %46, %50 : vector<4x32xf32>
    %52 = vector.extract_strided_slice %20 {offsets = [0, 0], sizes = [4, 32], strides = [1, 1]} : vector<4x128xf32> to vector<4x32xf32>
    %cst_31 = arith.constant 5.000000e-01 : f32
    %53 = vector.broadcast %cst_31 : f32 to vector<4x32xf32>
    %54 = arith.mulf %53, %52 : vector<4x32xf32>
    %55 = math.tanh %54 : vector<4x32xf32>
    %cst_32 = arith.constant 5.000000e-01 : f32
    %56 = vector.broadcast %cst_32 : f32 to vector<4x32xf32>
    %57 = arith.mulf %56, %55 : vector<4x32xf32>
    %cst_33 = arith.constant 5.000000e-01 : f32
    %58 = vector.broadcast %cst_33 : f32 to vector<4x32xf32>
    %59 = arith.addf %57, %58 : vector<4x32xf32>
    %60 = vector.extract_strided_slice %20 {offsets = [0, 32], sizes = [4, 32], strides = [1, 1]} : vector<4x128xf32> to vector<4x32xf32>
    %cst_34 = arith.constant 5.000000e-01 : f32
    %61 = vector.broadcast %cst_34 : f32 to vector<4x32xf32>
    %62 = arith.mulf %61, %60 : vector<4x32xf32>
    %63 = math.tanh %62 : vector<4x32xf32>
    %cst_35 = arith.constant 5.000000e-01 : f32
    %64 = vector.broadcast %cst_35 : f32 to vector<4x32xf32>
    %65 = arith.mulf %64, %63 : vector<4x32xf32>
    %cst_36 = arith.constant 5.000000e-01 : f32
    %66 = vector.broadcast %cst_36 : f32 to vector<4x32xf32>
    %67 = arith.addf %65, %66 : vector<4x32xf32>
    %68 = vector.extract_strided_slice %20 {offsets = [0, 64], sizes = [4, 32], strides = [1, 1]} : vector<4x128xf32> to vector<4x32xf32>
    %69 = math.tanh %68 : vector<4x32xf32>
    %70 = vector.extract_strided_slice %20 {offsets = [0, 96], sizes = [4, 32], strides = [1, 1]} : vector<4x128xf32> to vector<4x32xf32>
    %cst_37 = arith.constant 5.000000e-01 : f32
    %71 = vector.broadcast %cst_37 : f32 to vector<4x32xf32>
    %72 = arith.mulf %71, %70 : vector<4x32xf32>
    %73 = math.tanh %72 : vector<4x32xf32>
    %cst_38 = arith.constant 5.000000e-01 : f32
    %74 = vector.broadcast %cst_38 : f32 to vector<4x32xf32>
    %75 = arith.mulf %74, %73 : vector<4x32xf32>
    %cst_39 = arith.constant 5.000000e-01 : f32
    %76 = vector.broadcast %cst_39 : f32 to vector<4x32xf32>
    %77 = arith.addf %75, %76 : vector<4x32xf32>
    %78 = arith.mulf %67, %12 : vector<4x32xf32>
    %79 = arith.mulf %59, %69 : vector<4x32xf32>
    %80 = arith.addf %78, %79 : vector<4x32xf32>
    %81 = math.tanh %80 : vector<4x32xf32>
    %82 = arith.mulf %77, %81 : vector<4x32xf32>
    %c0_40 = arith.constant 0 : index
    %c0_41 = arith.constant 0 : index
    %c0_42 = arith.constant 0 : index
    %83 = vector.load %arg7[%c0_40, %c0_41, %c0_42] : memref<2x4x32xf32, #tpu.memory_space<vmem>>, vector<1x4x32xf32>
    %84 = vector.shape_cast %83 : vector<1x4x32xf32> to vector<4x32xf32>
    %85 = vector.shape_cast %51 : vector<4x32xf32> to vector<1x4x32xf32>
    tpu.vector_store %arg7[%c0_40, %c0_41, %c0_42], %85 {strides = array<i32>} : memref<2x4x32xf32, #tpu.memory_space<vmem>>, vector<1x4x32xf32>,
    %c1_43 = arith.constant 1 : index
    %c0_44 = arith.constant 0 : index
    %c0_45 = arith.constant 0 : index
    %86 = vector.load %arg8[%c1_43, %c0_44, %c0_45] : memref<2x4x32xf32, #tpu.memory_space<vmem>>, vector<1x4x32xf32>
    %87 = vector.shape_cast %86 : vector<1x4x32xf32> to vector<4x32xf32>
    %88 = vector.shape_cast %82 : vector<4x32xf32> to vector<1x4x32xf32>
    tpu.vector_store %arg8[%c1_43, %c0_44, %c0_45], %88 {strides = array<i32>} : memref<2x4x32xf32, #tpu.memory_space<vmem>>, vector<1x4x32xf32>,
    %c1_46 = arith.constant 1 : index
    %c0_47 = arith.constant 0 : index
    %c0_48 = arith.constant 0 : index
    %89 = vector.load %arg1[%c1_46, %c0_47, %c0_48] : memref<2x4x128xf32, #tpu.memory_space<vmem>>, vector<1x4x128xf32>
    %90 = vector.shape_cast %89 : vector<1x4x128xf32> to vector<4x128xf32>
    %cst_49 = arith.constant dense<0.000000e+00> : vector<4x128xf32>
    %91 = tpu.matmul %51, %3, %cst_49 {dimension_numbers = #tpu.dot_dimension_numbers<[1], [0], [0], [1], [0, 0, 1, 1], [], []>} : vector<4x32xf32>, vector<32x128xf32>, vector<4x128xf32> -> vector<4x128xf32>
    %92 = arith.addf %90, %91 : vector<4x128xf32>
    %c0_50 = arith.constant 0 : index
    %c0_51 = arith.constant 0 : index
    %c0_52 = arith.constant 0 : index
    %93 = vector.load %arg2[%c0_50, %c0_51, %c0_52] : memref<2x4x128xf32, #tpu.memory_space<vmem>>, vector<1x4x128xf32>
    %94 = vector.shape_cast %93 : vector<1x4x128xf32> to vector<4x128xf32>
    %cst_53 = arith.constant dense<0.000000e+00> : vector<4x128xf32>
    %95 = tpu.matmul %82, %4, %cst_53 {dimension_numbers = #tpu.dot_dimension_numbers<[1], [0], [0], [1], [0, 0, 1, 1], [], []>} : vector<4x32xf32>, vector<32x128xf32>, vector<4x128xf32> -> vector<4x128xf32>
    %96 = arith.addf %94, %95 : vector<4x128xf32>
    %97 = vector.extract_strided_slice %92 {offsets = [0, 0], sizes = [4, 32], strides = [1, 1]} : vector<4x128xf32> to vector<4x32xf32>
    %cst_54 = arith.constant 5.000000e-01 : f32
    %98 = vector.broadcast %cst_54 : f32 to vector<4x32xf32>
    %99 = arith.mulf %98, %97 : vector<4x32xf32>
    %100 = math.tanh %99 : vector<4x32xf32>
    %cst_55 = arith.constant 5.000000e-01 : f32
    %101 = vector.broadcast %cst_55 : f32 to vector<4x32xf32>
    %102 = arith.mulf %101, %100 : vector<4x32xf32>
    %cst_56 = arith.constant 5.000000e-01 : f32
    %103 = vector.broadcast %cst_56 : f32 to vector<4x32xf32>
    %104 = arith.addf %102, %103 : vector<4x32xf32>
    %105 = vector.extract_strided_slice %92 {offsets = [0, 32], sizes = [4, 32], strides = [1, 1]} : vector<4x128xf32> to vector<4x32xf32>
    %cst_57 = arith.constant 5.000000e-01 : f32
    %106 = vector.broadcast %cst_57 : f32 to vector<4x32xf32>
    %107 = arith.mulf %106, %105 : vector<4x32xf32>
    %108 = math.tanh %107 : vector<4x32xf32>
    %cst_58 = arith.constant 5.000000e-01 : f32
    %109 = vector.broadcast %cst_58 : f32 to vector<4x32xf32>
    %110 = arith.mulf %109, %108 : vector<4x32xf32>
    %cst_59 = arith.constant 5.000000e-01 : f32
    %111 = vector.broadcast %cst_59 : f32 to vector<4x32xf32>
    %112 = arith.addf %110, %111 : vector<4x32xf32>
    %113 = vector.extract_strided_slice %92 {offsets = [0, 64], sizes = [4, 32], strides = [1, 1]} : vector<4x128xf32> to vector<4x32xf32>
    %114 = math.tanh %113 : vector<4x32xf32>
    %115 = vector.extract_strided_slice %92 {offsets = [0, 96], sizes = [4, 32], strides = [1, 1]} : vector<4x128xf32> to vector<4x32xf32>
    %cst_60 = arith.constant 5.000000e-01 : f32
    %116 = vector.broadcast %cst_60 : f32 to vector<4x32xf32>
    %117 = arith.mulf %116, %115 : vector<4x32xf32>
    %118 = math.tanh %117 : vector<4x32xf32>
    %cst_61 = arith.constant 5.000000e-01 : f32
    %119 = vector.broadcast %cst_61 : f32 to vector<4x32xf32>
    %120 = arith.mulf %119, %118 : vector<4x32xf32>
    %cst_62 = arith.constant 5.000000e-01 : f32
    %121 = vector.broadcast %cst_62 : f32 to vector<4x32xf32>
    %122 = arith.addf %120, %121 : vector<4x32xf32>
    %123 = arith.mulf %112, %49 : vector<4x32xf32>
    %124 = arith.mulf %104, %114 : vector<4x32xf32>
    %125 = arith.addf %123, %124 : vector<4x32xf32>
    %126 = math.tanh %125 : vector<4x32xf32>
    %127 = arith.mulf %122, %126 : vector<4x32xf32>
    %128 = vector.extract_strided_slice %96 {offsets = [0, 0], sizes = [4, 32], strides = [1, 1]} : vector<4x128xf32> to vector<4x32xf32>
    %cst_63 = arith.constant 5.000000e-01 : f32
    %129 = vector.broadcast %cst_63 : f32 to vector<4x32xf32>
    %130 = arith.mulf %129, %128 : vector<4x32xf32>
    %131 = math.tanh %130 : vector<4x32xf32>
    %cst_64 = arith.constant 5.000000e-01 : f32
    %132 = vector.broadcast %cst_64 : f32 to vector<4x32xf32>
    %133 = arith.mulf %132, %131 : vector<4x32xf32>
    %cst_65 = arith.constant 5.000000e-01 : f32
    %134 = vector.broadcast %cst_65 : f32 to vector<4x32xf32>
    %135 = arith.addf %133, %134 : vector<4x32xf32>
    %136 = vector.extract_strided_slice %96 {offsets = [0, 32], sizes = [4, 32], strides = [1, 1]} : vector<4x128xf32> to vector<4x32xf32>
    %cst_66 = arith.constant 5.000000e-01 : f32
    %137 = vector.broadcast %cst_66 : f32 to vector<4x32xf32>
    %138 = arith.mulf %137, %136 : vector<4x32xf32>
    %139 = math.tanh %138 : vector<4x32xf32>
    %cst_67 = arith.constant 5.000000e-01 : f32
    %140 = vector.broadcast %cst_67 : f32 to vector<4x32xf32>
    %141 = arith.mulf %140, %139 : vector<4x32xf32>
    %cst_68 = arith.constant 5.000000e-01 : f32
    %142 = vector.broadcast %cst_68 : f32 to vector<4x32xf32>
    %143 = arith.addf %141, %142 : vector<4x32xf32>
    %144 = vector.extract_strided_slice %96 {offsets = [0, 64], sizes = [4, 32], strides = [1, 1]} : vector<4x128xf32> to vector<4x32xf32>
    %145 = math.tanh %144 : vector<4x32xf32>
    %146 = vector.extract_strided_slice %96 {offsets = [0, 96], sizes = [4, 32], strides = [1, 1]} : vector<4x128xf32> to vector<4x32xf32>
    %cst_69 = arith.constant 5.000000e-01 : f32
    %147 = vector.broadcast %cst_69 : f32 to vector<4x32xf32>
    %148 = arith.mulf %147, %146 : vector<4x32xf32>
    %149 = math.tanh %148 : vector<4x32xf32>
    %cst_70 = arith.constant 5.000000e-01 : f32
    %150 = vector.broadcast %cst_70 : f32 to vector<4x32xf32>
    %151 = arith.mulf %150, %149 : vector<4x32xf32>
    %cst_71 = arith.constant 5.000000e-01 : f32
    %152 = vector.broadcast %cst_71 : f32 to vector<4x32xf32>
    %153 = arith.addf %151, %152 : vector<4x32xf32>
    %154 = arith.mulf %143, %80 : vector<4x32xf32>
    %155 = arith.mulf %135, %145 : vector<4x32xf32>
    %156 = arith.addf %154, %155 : vector<4x32xf32>
    %157 = math.tanh %156 : vector<4x32xf32>
    %158 = arith.mulf %153, %157 : vector<4x32xf32>
    %c1_72 = arith.constant 1 : index
    %c0_73 = arith.constant 0 : index
    %c0_74 = arith.constant 0 : index
    %159 = vector.load %arg7[%c1_72, %c0_73, %c0_74] : memref<2x4x32xf32, #tpu.memory_space<vmem>>, vector<1x4x32xf32>
    %160 = vector.shape_cast %159 : vector<1x4x32xf32> to vector<4x32xf32>
    %161 = vector.shape_cast %127 : vector<4x32xf32> to vector<1x4x32xf32>
    tpu.vector_store %arg7[%c1_72, %c0_73, %c0_74], %161 {strides = array<i32>} : memref<2x4x32xf32, #tpu.memory_space<vmem>>, vector<1x4x32xf32>,
    %c0_75 = arith.constant 0 : index
    %c0_76 = arith.constant 0 : index
    %c0_77 = arith.constant 0 : index
    %162 = vector.load %arg8[%c0_75, %c0_76, %c0_77] : memref<2x4x32xf32, #tpu.memory_space<vmem>>, vector<1x4x32xf32>
    %163 = vector.shape_cast %162 : vector<1x4x32xf32> to vector<4x32xf32>
    %164 = vector.shape_cast %158 : vector<4x32xf32> to vector<1x4x32xf32>
    tpu.vector_store %arg8[%c0_75, %c0_76, %c0_77], %164 {strides = array<i32>} : memref<2x4x32xf32, #tpu.memory_space<vmem>>, vector<1x4x32xf32>,
    %c0_78 = arith.constant 0 : index
    %c0_79 = arith.constant 0 : index
    %c0_80 = arith.constant 0 : index
    %165 = vector.load %arg11[%c0_78, %c0_79, %c0_80] : memref<2x4x32xf32, #tpu.memory_space<vmem>>, vector<1x4x32xf32>
    %166 = vector.shape_cast %165 : vector<1x4x32xf32> to vector<4x32xf32>
    %167 = vector.shape_cast %127 : vector<4x32xf32> to vector<1x4x32xf32>
    tpu.vector_store %arg11[%c0_78, %c0_79, %c0_80], %167 {strides = array<i32>} : memref<2x4x32xf32, #tpu.memory_space<vmem>>, vector<1x4x32xf32>,
    %c0_81 = arith.constant 0 : index
    %c0_82 = arith.constant 0 : index
    %c0_83 = arith.constant 0 : index
    %168 = vector.load %arg12[%c0_81, %c0_82, %c0_83] : memref<2x4x32xf32, #tpu.memory_space<vmem>>, vector<1x4x32xf32>
    %169 = vector.shape_cast %168 : vector<1x4x32xf32> to vector<4x32xf32>
    %170 = vector.shape_cast %125 : vector<4x32xf32> to vector<1x4x32xf32>
    tpu.vector_store %arg12[%c0_81, %c0_82, %c0_83], %170 {strides = array<i32>} : memref<2x4x32xf32, #tpu.memory_space<vmem>>, vector<1x4x32xf32>,
    %c1_84 = arith.constant 1 : index
    %c0_85 = arith.constant 0 : index
    %c0_86 = arith.constant 0 : index
    %171 = vector.load %arg11[%c1_84, %c0_85, %c0_86] : memref<2x4x32xf32, #tpu.memory_space<vmem>>, vector<1x4x32xf32>
    %172 = vector.shape_cast %171 : vector<1x4x32xf32> to vector<4x32xf32>
    %173 = vector.shape_cast %158 : vector<4x32xf32> to vector<1x4x32xf32>
    tpu.vector_store %arg11[%c1_84, %c0_85, %c0_86], %173 {strides = array<i32>} : memref<2x4x32xf32, #tpu.memory_space<vmem>>, vector<1x4x32xf32>,
    %c1_87 = arith.constant 1 : index
    %c0_88 = arith.constant 0 : index
    %c0_89 = arith.constant 0 : index
    %174 = vector.load %arg12[%c1_87, %c0_88, %c0_89] : memref<2x4x32xf32, #tpu.memory_space<vmem>>, vector<1x4x32xf32>
    %175 = vector.shape_cast %174 : vector<1x4x32xf32> to vector<4x32xf32>
    %176 = vector.shape_cast %156 : vector<4x32xf32> to vector<1x4x32xf32>
    tpu.vector_store %arg12[%c1_87, %c0_88, %c0_89], %176 {strides = array<i32>} : memref<2x4x32xf32, #tpu.memory_space<vmem>>, vector<1x4x32xf32>,
    %c3_i32 = arith.constant 3 : i32
    %177 = arith.cmpi eq, %arg0, %c3_i32 : i32
    %178 = arith.extui %177 : i1 to i32
    %c0_i32_90 = arith.constant 0 : i32
    %179 = arith.cmpi ne, %178, %c0_i32_90 : i32
    scf.if %179 {
      %c0_91 = arith.constant 0 : index
      %c0_92 = arith.constant 0 : index
      %c0_93 = arith.constant 0 : index
      %180 = vector.load %arg11[%c0_91, %c0_92, %c0_93] : memref<2x4x32xf32, #tpu.memory_space<vmem>>, vector<2x4x32xf32>
      %c0_94 = arith.constant 0 : index
      %c0_95 = arith.constant 0 : index
      %c0_96 = arith.constant 0 : index
      %181 = vector.load %arg9[%c0_94, %c0_95, %c0_96] : memref<2x4x32xf32, #tpu.memory_space<vmem>>, vector<2x4x32xf32>
      tpu.vector_store %arg9[%c0_94, %c0_95, %c0_96], %180 {strides = array<i32>} : memref<2x4x32xf32, #tpu.memory_space<vmem>>, vector<2x4x32xf32>,
      %c0_97 = arith.constant 0 : index
      %c0_98 = arith.constant 0 : index
      %c0_99 = arith.constant 0 : index
      %182 = vector.load %arg12[%c0_97, %c0_98, %c0_99] : memref<2x4x32xf32, #tpu.memory_space<vmem>>, vector<2x4x32xf32>
      %c0_100 = arith.constant 0 : index
      %c0_101 = arith.constant 0 : index
      %c0_102 = arith.constant 0 : index
      %183 = vector.load %arg10[%c0_100, %c0_101, %c0_102] : memref<2x4x32xf32, #tpu.memory_space<vmem>>, vector<2x4x32xf32>
      tpu.vector_store %arg10[%c0_100, %c0_101, %c0_102], %182 {strides = array<i32>} : memref<2x4x32xf32, #tpu.memory_space<vmem>>, vector<2x4x32xf32>,
    } else {
    }
    return
  }
  func.func @transform_0(%arg0: i32) -> (i32, i32, i32) {
    %c0_i32 = arith.constant 0 : i32
    %c0_i32_0 = arith.constant 0 : i32
    %c0_i32_1 = arith.constant 0 : i32
    return %arg0, %c0_i32, %c0_i32_0 : i32, i32, i32
  }
  func.func @transform_1(%arg0: i32) -> (i32, i32, i32) {
    %c3_i32 = arith.constant 3 : i32
    %0 = arith.subi %c3_i32, %arg0 : i32
    %c0_i32 = arith.constant 0 : i32
    %c0_i32_0 = arith.constant 0 : i32
    %c0_i32_1 = arith.constant 0 : i32
    return %0, %c0_i32, %c0_i32_0 : i32, i32, i32
  }
  func.func @transform_4(%arg0: i32) -> (i32, i32, i32) {
    %c0_i32 = arith.constant 0 : i32
    %c0_i32_0 = arith.constant 0 : i32
    %c0_i32_1 = arith.constant 0 : i32
    %c0_i32_2 = arith.constant 0 : i32
    return %c0_i32, %c0_i32_0, %c0_i32_1 : i32, i32, i32
  }
  func.func @transform_5(%arg0: i32) -> (i32, i32, i32) {
    %c0_i32 = arith.constant 0 : i32
    %c0_i32_0 = arith.constant 0 : i32
    %c0_i32_1 = arith.constant 0 : i32
    %c0_i32_2 = arith.constant 0 : i32
    return %c0_i32, %c0_i32_0, %c0_i32_1 : i32, i32, i32
  }
  func.func @transform_6(%arg0: i32) -> (i32, i32, i32) {
    %c0_i32 = arith.constant 0 : i32
    %c0_i32_0 = arith.constant 0 : i32
    %c0_i32_1 = arith.constant 0 : i32
    return %arg0, %c0_i32, %c0_i32_0 : i32, i32, i32
  }
  func.func @transform_7(%arg0: i32) -> (i32, i32, i32) {
    %c3_i32 = arith.constant 3 : i32
    %0 = arith.subi %c3_i32, %arg0 : i32
    %c0_i32 = arith.constant 0 : i32
    %c0_i32_0 = arith.constant 0 : i32
    %c0_i32_1 = arith.constant 0 : i32
    return %0, %c0_i32, %c0_i32_0 : i32, i32, i32
  }
  func.func @transform_8(%arg0: i32) -> (i32, i32, i32) {
    %c0_i32 = arith.constant 0 : i32
    %c0_i32_0 = arith.constant 0 : i32
    %c0_i32_1 = arith.constant 0 : i32
    %c0_i32_2 = arith.constant 0 : i32
    return %c0_i32, %c0_i32_0, %c0_i32_1 : i32, i32, i32
  }
  func.func @transform_9(%arg0: i32) -> (i32, i32, i32) {
    %c0_i32 = arith.constant 0 : i32
    %c0_i32_0 = arith.constant 0 : i32
    %c0_i32_1 = arith.constant 0 : i32
    %c0_i32_2 = arith.constant 0 : i32
    return %c0_i32, %c0_i32_0, %c0_i32_1 : i32, i32, i32
  }
}

</mosaic_0001>

<bundles_post_ra>
// kernel: bidir_lstm_layer_pallas.1
= control target key start
LH: loop header
LB: loop body
LE: loop exit
PB: predicated region body
PF: predicated region fallthrough
CT: control target
= control target key end

     0   :  { %s916_s30 = smov 0   ;;  %s1043_s0 = inlined_call_operand.vmem [shape: f32[8,4,128], index: 0, kind: input, shape index: {}]   ;;  %s1044_s1 = inlined_call_operand.vmem [shape: f32[8,4,128], index: 1, kind: input, shape index: {}]   ;;  %s1045_s2 = inlined_call_operand.vmem [shape: f32[32,128], index: 2, kind: input, shape index: {}]   ;;  %s1046_s3 = inlined_call_operand.vmem [shape: f32[32,128], index: 3, kind: input, shape index: {}]   ;;  %s1047_s4 = inlined_call_operand.vmem [shape: f32[2,4,32], index: 4, kind: input, shape index: {}, may-alias: {4,8}]   ;;  %s1048_s5 = inlined_call_operand.vmem [shape: f32[2,4,32], index: 5, kind: input, shape index: {}, may-alias: {5,9}]   ;;  %s1049_s6 = inlined_call_operand.vmem [shape: f32[8,4,32], index: 6, kind: output, shape index: {0}]   ;;  %s1050_s7 = inlined_call_operand.vmem [shape: f32[8,4,32], index: 7, kind: output, shape index: {1}]   ;;  %s1051_s8 = inlined_call_operand.vmem [shape: f32[2,4,32], index: 8, kind: output, shape index: {2}, may-alias: {4,8}]   ;;  %s1052_s9 = inlined_call_operand.vmem [shape: f32[2,4,32], index: 9, kind: output, shape index: {3}, may-alias: {5,9}]  }
   0x1 LB: > { %s922_s10 = sadd.s32 4294967295, %s861_s30   ;;  %p793_p0 = scmp.ge.s32.totalorder %s861_s30, 1  ;;  %s861_s30 = sphi %s916_s30, %s20_s30  }
   0x2   : > { %p254_p1 = scmp.lt.s32.totalorder %s861_s30, 5 }
   0x4   : > { %p255_p2 = pnand %p793_p0, %p254_p1 }
   0x5   : > { %s794_s11 = sshll.u32 (!%p255_p2), %s922_s10, 1  ;;  %s304_s12 = ssub.s32 (!%p255_p2), 3, %s922_s10 }
   0x6   : > { %258 = sbr.rel (%p255_p2) target bundleno = 1216 (0x4c0), region = 36  ;;  %p299_p3 = scmp.lt.s32.totalorder (!%p255_p2), %s794_s11, 7 }
   0x7   : > { %s796_s13 = sshll.u32 (!%p255_p2), %s304_s12, 1  ;;  %p802_p5 = scmp.ne.s32.totalorder (!%p255_p2), %s922_s10, 0 }
   0x8   : > { %p306_p4 = scmp.lt.s32.totalorder (!%p255_p2), %s796_s13, 7 }
   0xb   : > { %s1054_s11 = smov (!%p299_p3, %s794_s11), 7  ;;  %s1056_s13 = smov (!%p306_p4, %s796_s13), 7 }
   0xc   : > { %s795_s14 = sshll.u32 %s1054_s11, 2  ;;  %s797_s18 = sshll.u32 %s1056_s13, 2 }
   0xd   : > { %s931_s17 = scalar_lea.vmem %s1043_s0, %s795_s14  ;;  %s936_s21 = scalar_lea.vmem %s1044_s1, %s797_s18 }
   0xe   : > { %s941_s24 = scalar_lea.vmem %s1049_s6, %s795_s14  ;;  %s946_s27 = scalar_lea.vmem %s1050_s7, %s797_s18 }
   0xf   : > { %329 = sbr.rel (%p802_p5) target bundleno = 39 (0x27), region = 40 }
  0x14   : > { %v340_v0 = vld [vmem:[%s1045_s2] sm:$0xff]  ;;  %v342_v1 = vld [vmem:[%s1045_s2 + $0x8] sm:$0xff]  ;;  %v344_v2 = vld [vmem:[%s1045_s2 + $0x10] sm:$0xff] }
  0x15   : > { %341 = vst [vmem:[#allocation4 + $0x10] sm:$0xff] %v340_v0  ;;  %v346_v3 = vld [vmem:[%s1045_s2 + $0x18] sm:$0xff] }
  0x16   : > { %343 = vst [vmem:[#allocation4] sm:$0xff] %v342_v1 }
  0x17   : > { %345 = vst [vmem:[#allocation4 + $0x18] sm:$0xff] %v344_v2 }
  0x18   : > { %347 = vst [vmem:[#allocation4 + $0x8] sm:$0xff] %v346_v3 }
  0x19   : > { %353 = vsyncadd [#allocation6], 512  ;;  %v365_v4 = vld [vmem:[%s1046_s3] sm:$0xff]  ;;  %v367_v5 = vld [vmem:[%s1046_s3 + $0x8] sm:$0xff] }
  0x1a   : > { %366 = vst [vmem:[#allocation5] sm:$0xff] %v365_v4  ;;  %v369_v6 = vld [vmem:[%s1046_s3 + $0x10] sm:$0xff]  ;;  %v371_v7 = vld [vmem:[%s1046_s3 + $0x18] sm:$0xff] }
  0x1b   : > { %368 = vst [vmem:[#allocation5 + $0x18] sm:$0xff] %v367_v5 }
  0x1c   : > { %370 = vst [vmem:[#allocation5 + $0x8] sm:$0xff] %v369_v6 }
  0x1d   : > { %372 = vst [vmem:[#allocation5 + $0x10] sm:$0xff] %v371_v7 }
  0x1e   : > { %378 = vsyncadd [#allocation6 + $0x1], 512  ;;  %v379_v8 = vld [vmem:[%s1047_s4] sm:$0xf]  ;;  %vm381_vm0 = vcmask 257024  }
  0x1f   : > { %382 = vst.msk [vmem:[#allocation2] sm:$0xf] %vm381_vm0, %v379_v8  ;;  %v380_v9 = vld [vmem:[%s1047_s4 + $0x4] sm:$0xf]  ;;  %v384_v10 = vld [vmem:[%s1048_s5] sm:$0xf] }
  0x20   : > { %383 = vst.msk [vmem:[#allocation2 + $0x4] sm:$0xf] %vm381_vm0, %v380_v9  ;;  %v385_v11 = vld [vmem:[%s1048_s5 + $0x4] sm:$0xf] }
  0x21   : > { %386 = vst.msk [vmem:[#allocation3] sm:$0xf] %vm381_vm0, %v384_v10 }
  0x22   : > { %387 = vst.msk [vmem:[#allocation3 + $0x4] sm:$0xf] %vm381_vm0, %v385_v11 }
  0x23   : > { %855 = dma.done.wait [#allocation6], 512 }
  0x24   : > { %856 = vsyncadd [#allocation6], 4294966784 }
  0x25   : > { %857 = dma.done.wait [#allocation6 + $0x1], 512 }
  0x26   : > { %858 = vsyncadd [#allocation6 + $0x1], 4294966784 }
  0x27 PF: > { %v396_v12 = vld [vmem:[#allocation4 + $0x8] sm:$0xff]  ;;  %v395_v13 = vld [vmem:[#allocation4 + $0x18] sm:$0xff]  ;;  %v400_v14 = vld [vmem:[#allocation5 + $0x10] sm:$0xff]  ;;  %s863_s19 = smov 32   ;;  %vm408_vm1 = vcmask 261120   ;;  %s864_s20 = smov 64  }
  0x28   : > { %424 = vmatpush.msra.mxu0 %v396_v12  ;;  %539 = vmatpush.msra.mxu2 %v396_v12  ;;  %v394_v15 = vld [vmem:[#allocation4] sm:$0xff]  ;;  %v399_v16 = vld [vmem:[#allocation5 + $0x8] sm:$0xff]  ;;  %v398_v17 = vld [vmem:[#allocation5 + $0x18] sm:$0xff]  ;;  %vm515_vm2 = vcmask 257024   ;;  %p811_p6 = scmp.ne.s32.totalorder %s922_s10, 3 }
  0x29   : > { %450 = vmatpush.msra.mxu1 %v400_v14  ;;  %563 = vmatpush.msra.mxu3 %v400_v14  ;;  %v402_v18 = vld [vmem:[#allocation3] sm:$0xf]  ;;  %v393_v19 = vld [vmem:[#allocation4 + $0x10] sm:$0xff]  ;;  %v397_v21 = vld [vmem:[#allocation5] sm:$0xff] }
  0x2a   : > { %425 = vmatpush.msra.mxu0 %v395_v13  ;;  %540 = vmatpush.msra.mxu2 %v395_v13  ;;  %v401_v20 = vld [vmem:[#allocation2] sm:$0xf]  ;;  %v404_v22 = vld [vmem:[#allocation2 + $0x4] sm:$0xf]  ;;  %v406_v23 = vld [vmem:[#allocation3 + $0x4] sm:$0xf] }
  0x2b   : > { %451 = vmatpush.msra.mxu1 %v399_v16  ;;  %465 = vrot.lane.b32.xlu1 %v402_v18, %s863_s19  ;;  %v407_v24 = vld [vmem:[%s931_s17] sm:$0xf]  ;;  %v804_v27 = vld [vmem:[%s936_s21 + $0x4] sm:$0xf] }
  0x2c   : > { %426 = vmatpush.msra.mxu0 %v394_v15  ;;  %541 = vmatpush.msra.mxu2 %v394_v15  ;;  %v807_v60 = vld [vmem:[%s931_s17 + $0x4] sm:$0xf]  ;;  %v548_v0 = vld [vmem:[%s936_s21] sm:$0xf]  ;;  %s865_s17 = smov 96  }
  0x2d   : > { %452 = vmatpush.msra.mxu1 %v398_v17  ;;  %564 = vmatpush.msra.mxu3 %v399_v16 }
  0x2e   : > { %427 = vmatpush.msra.mxu0 %v393_v19  ;;  %542 = vmatpush.msra.mxu2 %v393_v19 }
  0x2f   : > { %803 = vmatmul.msk.f32.vlgmr.msra.gmra.mxu0 %vm408_vm1, %v401_v20  ;;  %453 = vmatpush.msra.mxu1 %v397_v21 }
  0x30   : > { %805 = vmatmul.msk.f32.vlgmr.msra.gmra.mxu1 %vm408_vm1, %v404_v22  ;;  %565 = vmatpush.msra.mxu3 %v398_v17 }
  0x32   : > { %566 = vmatpush.msra.mxu3 %v397_v21 }
  0x33   : > { %491 = vrot.lane.b32.xlu1 %v406_v23, %s863_s19 }
  0x9d   : > { %v466_v44 = vpop.permute.xlu1 %465 }
  0xa5   : > { %v492_v48 = vpop.permute.xlu1 %491 }
  0xac   : > { %v429_v25 = vpop.f32.mrf.mxu0 }
  0xad   : > { %v432_v26 = vadd.f32 %v429_v25, %v407_v24  ;;  %v455_v28 = vpop.f32.mrf.mxu1 }
  0xae   : > { %v458_v29 = vadd.f32 %v804_v27, %v455_v28 }
  0xaf   : > { %827 = vtanh.f32 %v432_v26  ;;  %v459_v32 = vmul.f32 0.5, %v432_v26 }
  0xb0   : > { %829 = vtanh.f32 %v458_v29  ;;  %v485_v33 = vmul.f32 0.5, %v458_v29 }
  0xb1   : > { %831 = vtanh.f32 %v459_v32 }
  0xb2   : > { %833 = vtanh.f32 %v485_v33 }
  0xb5   : > { %v828_v30 = vpop.eup %827 }
  0xb6   : > { %470 = vrot.lane.b32.xlu0 %v828_v30, %s864_s20  ;;  %v830_v31 = vpop.eup %829 }
  0xb7   : > { %v832_v34 = vpop.eup %831 }
  0xb8   : > { %v461_v35 = vmul.f32 0.5, %v832_v34  ;;  %v834_v37 = vpop.eup %833 }
  0xb9   : > { %v487_v40 = vmul.f32 0.5, %v834_v37 }
  0xba   : > { %v462_v36 = vadd.f32 0.5, %v461_v35 }
  0xbb   : > { %v488_v41 = vadd.f32 0.5, %v487_v40 }
  0xbc   : > { %v468_v45 = vmul.f32 %v466_v44, %v462_v36 }
  0xbd   : > { %v494_v49 = vmul.f32 %v492_v48, %v488_v41 }
  0xbe   : > { %496 = vrot.lane.b32.xlu0 %v830_v31, %s864_s20 }
 0x128   : > { %v471_v38 = vpop.permute.xlu0 %470 }
 0x129   : > { %v473_v39 = vmul.f32 %v471_v38, %v462_v36 }
 0x12b   : > { %475 = vrot.lane.b32.xlu2 %v473_v39, %s863_s19 }
 0x130   : > { %v497_v42 = vpop.permute.xlu0 %496 }
 0x131   : > { %v499_v43 = vmul.f32 %v497_v42, %v488_v41 }
 0x133   : > { %501 = vrot.lane.b32.xlu2 %v499_v43, %s863_s19 }
 0x185   : > { %v476_v46 = vpop.permute.xlu2 %475 }
 0x186   : > { %v478_v47 = vadd.f32 %v476_v46, %v468_v45 }
 0x188   : > { %835 = vtanh.f32 %v478_v47 }
 0x18d   : > { %v502_v50 = vpop.permute.xlu2 %501 }
 0x18e   : > { %v836_v51 = vpop.eup %835  ;;  %v504_v52 = vadd.f32 %v502_v50, %v494_v49 }
 0x18f   : > { %481 = vrot.lane.b32.xlu0 %v836_v51, %s864_s20 }
 0x190   : > { %837 = vtanh.f32 %v504_v52 }
 0x196   : > { %v838_v53 = vpop.eup %837 }
 0x197   : > { %507 = vrot.lane.b32.xlu1 %v838_v53, %s864_s20 }
 0x201   : > { %v482_v54 = vpop.permute.xlu0 %481 }
 0x202   : > { %v484_v55 = vmul.f32 %v482_v54, %v462_v36 }
 0x204   : > { %512 = vrot.lane.b32.xlu2 %v484_v55, %s863_s19 }
 0x209   : > { %v508_v56 = vpop.permute.xlu1 %507 }
 0x20a   : > { %v510_v57 = vmul.f32 %v508_v56, %v488_v41 }
 0x20c   : > { %518 = vrot.lane.b32.xlu0 %v510_v57, %s863_s19 }
 0x25e   : > { %v513_v58 = vpop.permute.xlu2 %512 }
 0x25f   : > { %516 = vst.msk [vmem:[%s941_s24] sm:$0xf] %vm515_vm2, %v513_v58  ;;  %808 = vmatmul.msk.f32.vlgmr.msra.gmra.mxu2 %vm408_vm1, %v513_v58 }
 0x27e   : > { %v519_v59 = vpop.permute.xlu0 %518 }
 0x27f   : > { %806 = vst.msk [vmem:[%s946_s27 + $0x4] sm:$0xf] %vm515_vm2, %v519_v59  ;;  %809 = vmatmul.msk.f32.vlgmr.msra.gmra.mxu3 %vm408_vm1, %v519_v59 }
 0x2e2   : > { %v544_v61 = vpop.f32.mrf.mxu2 }
 0x2e3   : > { %v547_v62 = vadd.f32 %v807_v60, %v544_v61 }
 0x2e5   : > { %839 = vtanh.f32 %v547_v62  ;;  %v572_v4 = vmul.f32 0.5, %v547_v62 }
 0x2eb   : > { %v840_v63 = vpop.eup %839 }
 0x2ec   : > { %579 = vrot.lane.b32.xlu1 %v840_v63, %s864_s20 }
 0x302   : > { %v568_v1 = vpop.f32.mrf.mxu3 }
 0x303   : > { %v571_v2 = vadd.f32 %v568_v1, %v548_v0 }
 0x305   : > { %841 = vtanh.f32 %v571_v2  ;;  %v594_v5 = vmul.f32 0.5, %v571_v2 }
 0x306   : > { %843 = vtanh.f32 %v572_v4 }
 0x307   : > { %845 = vtanh.f32 %v594_v5 }
 0x30b   : > { %v842_v3 = vpop.eup %841 }
 0x30c   : > { %601 = vrot.lane.b32.xlu2 %v842_v3, %s864_s20  ;;  %v844_v6 = vpop.eup %843 }
 0x30d   : > { %v574_v7 = vmul.f32 0.5, %v844_v6  ;;  %v846_v9 = vpop.eup %845 }
 0x30e   : > { %v596_v12 = vmul.f32 0.5, %v846_v9 }
 0x30f   : > { %v575_v8 = vadd.f32 0.5, %v574_v7 }
 0x310   : > { %v597_v13 = vadd.f32 0.5, %v596_v12 }
 0x311   : > { %v577_v16 = vmul.f32 %v575_v8, %v478_v47 }
 0x312   : > { %v599_v19 = vmul.f32 %v597_v13, %v504_v52 }
 0x35e   : > { %v580_v10 = vpop.permute.xlu1 %579 }
 0x35f   : > { %v582_v11 = vmul.f32 %v580_v10, %v575_v8 }
 0x361   : > { %584 = vrot.lane.b32.xlu0 %v582_v11, %s863_s19 }
 0x366   : > { %v602_v14 = vpop.permute.xlu2 %601 }
 0x367   : > { %v604_v15 = vmul.f32 %v602_v14, %v597_v13 }
 0x369   : > { %606 = vrot.lane.b32.xlu1 %v604_v15, %s863_s19 }
 0x3d3   : > { %v585_v17 = vpop.permute.xlu0 %584 }
 0x3d4   : > { %v587_v18 = vadd.f32 %v585_v17, %v577_v16 }
 0x3d6   : > { %847 = vtanh.f32 %v587_v18 }
 0x3db   : > { %v607_v20 = vpop.permute.xlu1 %606 }
 0x3dc   : > { %v848_v21 = vpop.eup %847  ;;  %v609_v22 = vadd.f32 %v607_v20, %v599_v19 }
 0x3dd   : > { %590 = vrot.lane.b32.xlu2 %v848_v21, %s864_s20 }
 0x3de   : > { %849 = vtanh.f32 %v609_v22 }
 0x3e4   : > { %v850_v23 = vpop.eup %849 }
 0x3e5   : > { %612 = vrot.lane.b32.xlu0 %v850_v23, %s864_s20 }
 0x3ed   : > { %629 = vrot.lane.b32.xlu0 %v587_v18, %s865_s17 }
 0x437   : > { %v591_v24 = vpop.permute.xlu2 %590 }
 0x438   : > { %v593_v25 = vmul.f32 %v591_v24, %v575_v8 }
 0x43a   : > { %617 = vrot.lane.b32.xlu1 %v593_v25, %s863_s19 }
 0x442   : > { %635 = vrot.lane.b32.xlu1 %v609_v22, %s865_s17 }
 0x457   : > { %v613_v26 = vpop.permute.xlu0 %612 }
 0x458   : > { %v615_v27 = vmul.f32 %v613_v26, %v597_v13 }
 0x45a   : > { %623 = vrot.lane.b32.xlu2 %v615_v27, %s863_s19 }
 0x45f   : > { %v630_v28 = vpop.permute.xlu0 %629 }
 0x460   : > { %632 = vst.msk [vmem:[#allocation3] sm:$0xf] %vm515_vm2, %v630_v28 }
 0x4ac   : > { %v618_v29 = vpop.permute.xlu1 %617 }
 0x4ad   : > { %810 = vst.msk [vmem:[%s941_s24 + $0x4] sm:$0xf] %vm515_vm2, %v618_v29 }
 0x4ae   : > { %627 = vst.msk [vmem:[#allocation2] sm:$0xf] %vm515_vm2, %v618_v29 }
 0x4b3   : > { %642 = sbr.rel (%p811_p6) target bundleno = 1216 (0x4c0), region = 82 }
 0x4b4   : > { %v636_v30 = vpop.permute.xlu1 %635  ;;  %v624_v31 = vpop.permute.xlu2 %623 }
 0x4b5   : > { %638 = vst.msk [vmem:[#allocation3 + $0x4] sm:$0xf] %vm515_vm2, %v636_v30 }
 0x4b6   : > { %626 = vst.msk [vmem:[%s946_s27] sm:$0xf] %vm515_vm2, %v624_v31 }
 0x4b7   : > { %633 = vst.msk [vmem:[#allocation2 + $0x4] sm:$0xf] %vm515_vm2, %v624_v31 }
 0x4b8   : > { %v643_v32 = vld [vmem:[#allocation2] sm:$0xf]  ;;  %v647_v34 = vld [vmem:[#allocation3] sm:$0xf] }
 0x4b9   : > { %645 = vst.msk [vmem:[%s1051_s8] sm:$0xf] %vm515_vm2, %v643_v32 }
 0x4ba   : > { %649 = vst.msk [vmem:[%s1052_s9] sm:$0xf] %vm515_vm2, %v647_v34 }
 0x4bc   : > { %v648_v35 = vld [vmem:[#allocation3 + $0x4] sm:$0xf] }
 0x4bd   : > { %650 = vst.msk [vmem:[%s1052_s9 + $0x4] sm:$0xf] %vm515_vm2, %v648_v35 }
 0x4be   : > { %v644_v33 = vld [vmem:[#allocation2 + $0x4] sm:$0xf] }
 0x4bf   : > { %646 = vst.msk [vmem:[%s1051_s8 + $0x4] sm:$0xf] %vm515_vm2, %v644_v33 }
 0x4c0 PF: > { %s20_s30 = sadd.s32 1, %s861_s30  }
 0x4c1   : > { %p17_p7 = scmp.ge.s32.totalorder %s20_s30, 6  }
 0x4c3   :  { %19 = sbr.rel (!%p17_p7) target bundleno = 1 (0x1), region = 159 }
 0x4c8   :  { %705 = vsyncmov [#allocation6] }
 0x4cb   :  { %s706_s28 = vpop.sfrf %705 }
 0x4cc   :  { %p814_p8 = scmp.ne.s32.totalorder %s706_s28, 0 }
 0x4ce   :  { %710 = shalt.err (%p814_p8)  }
 0x4cf   :  { %712 = vsyncmov [#allocation6 + $0x1] }
 0x4d2   :  { %s713_s29 = vpop.sfrf %712 }
 0x4d3   :  { %p815_p9 = scmp.ne.s32.totalorder %s713_s29, 0 }
 0x4d5   :  { %717 = shalt.err (%p815_p9)  }

</bundles_post_ra>
